<compile_context>
chip_gen: v7x
topology: tpu7x:2x2x1
jax: 0.10.0
libtpu: 0.0.40
codegen_flags: <defaults>
</compile_context>

<pallas_src>
import functools

import jax
import jax.numpy as jnp
from jax import lax
from jax.experimental import pallas as pl
from jax.experimental.pallas import tpu as pltpu


def _phase_encoder_kernel(wt_ref, bias_ref, pt_ref, out_ref):
    # wt: (2C, 2K) packed weights, bias: (2C, 1), pt: (2K, TN), out: (C, TN)
    acc = jnp.dot(wt_ref[...], pt_ref[...], preferred_element_type=jnp.float32)
    acc = acc + bias_ref[...]                      # broadcast along lanes
    C = out_ref.shape[0]
    c_real = acc[:C, :]
    c_imag = acc[C:, :]
    mag_sq = c_real * c_real + c_imag * c_imag
    # |z| ** 0.5 == (re^2 + im^2) ** 0.25
    out_ref[...] = jnp.sqrt(jnp.sqrt(mag_sq)).astype(out_ref.dtype)


def _round_up(x, m):
    return ((x + m - 1) // m) * m


def _im2col_t(x, kh, kw, stride, padding):
    """x: (B, H, W) -> transposed patches (kh*kw, B*Ho*Wo), plus (Ho, Wo)."""
    B, H, W = x.shape
    xp = jnp.pad(x, ((0, 0), (padding, padding), (padding, padding)))
    Ho = (H + 2 * padding - kh) // stride + 1
    Wo = (W + 2 * padding - kw) // stride + 1
    rows = []
    for i in range(kh):
        for j in range(kw):
            rows.append(xp[:, i:i + stride * Ho:stride, j:j + stride * Wo:stride])
    p = jnp.stack(rows, axis=0)                     # (K, B, Ho, Wo)
    return p.reshape(kh * kw, B * Ho * Wo), Ho, Wo


@functools.partial(jax.jit, static_argnames=("kernel_size", "stride", "padding"))
def phase_encoder_forward(x, w_real, b_real, w_imag, b_imag, *,
                          kernel_size, stride, padding):
    """x: (B, 2, H, W) float32.  Returns (B, C, Ho, Wo) float32."""
    B = x.shape[0]
    C = w_real.shape[0]
    kh = kw = kernel_size
    K = kh * kw

    x_real = x[:, 0, :, :]
    x_imag = x[:, 1, :, :]

    # Transposed im2col: spatial positions in the (fast) lane dim.
    pr_t, Ho, Wo = _im2col_t(x_real, kh, kw, stride, padding)   # (K, N)
    pi_t, _, _ = _im2col_t(x_imag, kh, kw, stride, padding)     # (K, N)
    N = B * Ho * Wo
    pt = jnp.concatenate([pr_t, pi_t], axis=0)                  # (2K, N)

    # Packed weights (2C, 2K):
    #   c_real = wr @ pr - wi @ pi ;  c_imag = wi @ pr + wr @ pi
    wr = w_real.reshape(C, K)
    wi = w_imag.reshape(C, K)
    wt = jnp.concatenate(
        [jnp.concatenate([wr, -wi], axis=1),
         jnp.concatenate([wi, wr], axis=1)], axis=0)            # (2C, 2K)

    # Folded bias column (2C, 1): [b_real - b_imag ; b_real + b_imag]
    bias = jnp.concatenate([b_real - b_imag, b_real + b_imag]).reshape(2 * C, 1)

    # Tile the spatial/lane dimension.  Keep tiles large (amortize ~0.35us per
    # grid step) but keep >= 2 grid steps when possible so the "parallel" axis
    # can shard across both TensorCores on v7x.
    LANE = 128
    TN_MAX = 4096
    N_lane = _round_up(N, LANE)
    if N_lane <= 2 * LANE:
        TN = LANE
    else:
        TN = min(TN_MAX, _round_up((N_lane + 1) // 2, LANE))
    N_pad = _round_up(N, TN)
    pt = jnp.pad(pt, ((0, 0), (0, N_pad - N)))

    out = pl.pallas_call(
        _phase_encoder_kernel,
        out_shape=jax.ShapeDtypeStruct((C, N_pad), jnp.float32),
        grid_spec=pltpu.PrefetchScalarGridSpec(
            num_scalar_prefetch=0,
            grid=(N_pad // TN,),
            in_specs=[
                pl.BlockSpec((2 * C, 2 * K), lambda n: (0, 0)),   # packed W^T
                pl.BlockSpec((2 * C, 1), lambda n: (0, 0)),       # packed bias
                pl.BlockSpec((2 * K, TN), lambda n: (0, n)),      # patches^T
            ],
            out_specs=pl.BlockSpec((C, TN), lambda n: (0, n)),
        ),
        compiler_params=pltpu.CompilerParams(
            dimension_semantics=("parallel",)),
    )(wt, bias, pt)

    out = out[:, :N]                                 # drop lane padding
    out = out.reshape(C, B, Ho, Wo)                  # (C, B, Ho, Wo)
    return jnp.transpose(out, (1, 0, 2, 3))          # NCHW, like PyTorch


def _reference(x, w_real, b_real, w_imag, b_imag, stride, padding):
    """Pure-JAX reference using lax.conv for verification."""
    def conv(inp, w, b):
        y = lax.conv_general_dilated(
            inp, w, window_strides=(stride, stride),
            padding=[(padding, padding), (padding, padding)],
            dimension_numbers=("NCHW", "OIHW", "NCHW"))
        return y + b[None, :, None, None]

    xr = x[:, 0:1, :, :]
    xi = x[:, 1:2, :, :]
    cr = conv(xr, w_real, b_real) - conv(xi, w_imag, b_imag)
    ci = conv(xi, w_real, b_real) + conv(xr, w_imag, b_imag)
    return jnp.sqrt(jnp.sqrt(cr * cr + ci * ci))


if __name__ == "__main__":
    # module hyper-params
    channels, kernel_size, stride, padding = 4, 3, 1, 1

    key = jax.random.PRNGKey(0)
    kx, kwr, kbr, kwi, kbi = jax.random.split(key, 5)

    B, H, W = 2, 16, 16
    x = jax.random.normal(kx, (B, 2, H, W), dtype=jnp.float32)

    # deterministic synthetic parameters (shapes match nn.Conv2d(1, C, k))
    w_real = 0.1 * jax.random.normal(kwr, (channels, 1, kernel_size, kernel_size),
                                     dtype=jnp.float32)
    b_real = 0.1 * jax.random.normal(kbr, (channels,), dtype=jnp.float32)
    w_imag = 0.1 * jax.random.normal(kwi, (channels, 1, kernel_size, kernel_size),
                                     dtype=jnp.float32)
    b_imag = 0.1 * jax.random.normal(kbi, (channels,), dtype=jnp.float32)

    out = phase_encoder_forward(x, w_real, b_real, w_imag, b_imag,
                                kernel_size=kernel_size, stride=stride,
                                padding=padding)
    out = jax.block_until_ready(out)

    ref = _reference(x, w_real, b_real, w_imag, b_imag, stride, padding)
    assert out.shape == (B, channels, H, W), out.shape
    assert jnp.allclose(out, ref, atol=1e-5, rtol=1e-5), \
        float(jnp.max(jnp.abs(out - ref)))

    print("KERNEL_OK")
</pallas_src>

<mosaic_0001>
module attributes {stable_mosaic.version = 11 : i64} {
  func.func @_phase_encoder_kernel(%arg0: i32, %arg1: memref<8x18xf32, #tpu.memory_space<vmem>>, %arg2: memref<8x1xf32, #tpu.memory_space<vmem>>, %arg3: memref<18x256xf32, #tpu.memory_space<vmem>>, %arg4: memref<4x256xf32, #tpu.memory_space<vmem>>) attributes {dimension_semantics = [#tpu.dimension_semantics<parallel>], iteration_bounds = array<i64: 2>, scalar_prefetch = 0 : i64, scratch_operands = 0 : i64, tpu.core_type = #tpu.core_type<tc>, window_params = [{pipeline_mode = #tpu.pipeline_mode<synchronous>, transform_indices = @transform_0, window_bounds = array<i64: 8, 18>}, {pipeline_mode = #tpu.pipeline_mode<synchronous>, transform_indices = @transform_1, window_bounds = array<i64: 8, 1>}, {transform_indices = @transform_2, window_bounds = array<i64: 18, 256>}, {transform_indices = @transform_3, window_bounds = array<i64: 4, 256>}]} {
    %c0 = arith.constant 0 : index
    %c0_0 = arith.constant 0 : index
    %0 = vector.load %arg1[%c0, %c0_0] : memref<8x18xf32, #tpu.memory_space<vmem>>, vector<8x18xf32>
    %c0_1 = arith.constant 0 : index
    %c0_2 = arith.constant 0 : index
    %1 = vector.load %arg3[%c0_1, %c0_2] : memref<18x256xf32, #tpu.memory_space<vmem>>, vector<18x256xf32>
    %cst = arith.constant dense<0.000000e+00> : vector<8x256xf32>
    %2 = tpu.matmul %0, %1, %cst {dimension_numbers = #tpu.dot_dimension_numbers<[1], [0], [0], [1], [0, 0, 1, 1], [], []>} : vector<8x18xf32>, vector<18x256xf32>, vector<8x256xf32> -> vector<8x256xf32>
    %c0_3 = arith.constant 0 : index
    %c0_4 = arith.constant 0 : index
    %3 = vector.load %arg2[%c0_3, %c0_4] : memref<8x1xf32, #tpu.memory_space<vmem>>, vector<8x1xf32>
    %4 = vector.broadcast %3 : vector<8x1xf32> to vector<8x256xf32>
    %5 = arith.addf %2, %4 : vector<8x256xf32>
    %6 = vector.extract_strided_slice %5 {offsets = [0, 0], sizes = [4, 256], strides = [1, 1]} : vector<8x256xf32> to vector<4x256xf32>
    %7 = vector.extract_strided_slice %5 {offsets = [4, 0], sizes = [4, 256], strides = [1, 1]} : vector<8x256xf32> to vector<4x256xf32>
    %8 = arith.mulf %6, %6 : vector<4x256xf32>
    %9 = arith.mulf %7, %7 : vector<4x256xf32>
    %10 = arith.addf %8, %9 : vector<4x256xf32>
    %11 = math.sqrt %10 : vector<4x256xf32>
    %12 = math.sqrt %11 : vector<4x256xf32>
    %c0_5 = arith.constant 0 : index
    %c0_6 = arith.constant 0 : index
    %13 = vector.load %arg4[%c0_5, %c0_6] : memref<4x256xf32, #tpu.memory_space<vmem>>, vector<4x256xf32>
    tpu.vector_store %arg4[%c0_5, %c0_6], %12 {strides = array<i32>} : memref<4x256xf32, #tpu.memory_space<vmem>>, vector<4x256xf32>,
    return
  }
  func.func @transform_0(%arg0: i32) -> (i32, i32) {
    %c0_i32 = arith.constant 0 : i32
    %c0_i32_0 = arith.constant 0 : i32
    %c0_i32_1 = arith.constant 0 : i32
    return %c0_i32, %c0_i32_0 : i32, i32
  }
  func.func @transform_1(%arg0: i32) -> (i32, i32) {
    %c0_i32 = arith.constant 0 : i32
    %c0_i32_0 = arith.constant 0 : i32
    %c0_i32_1 = arith.constant 0 : i32
    return %c0_i32, %c0_i32_0 : i32, i32
  }
  func.func @transform_2(%arg0: i32) -> (i32, i32) {
    %c0_i32 = arith.constant 0 : i32
    %c0_i32_0 = arith.constant 0 : i32
    return %c0_i32, %arg0 : i32, i32
  }
  func.func @transform_3(%arg0: i32) -> (i32, i32) {
    %c0_i32 = arith.constant 0 : i32
    %c0_i32_0 = arith.constant 0 : i32
    return %c0_i32, %arg0 : i32, i32
  }
}

</mosaic_0001>

<bundles_post_ra>
// kernel: neg.1
= control target key start
LH: loop header
LB: loop body
LE: loop exit
PB: predicated region body
PF: predicated region fallthrough
CT: control target
= control target key end

     0   :  { %s24_s0 = inlined_call_operand.vmem [shape: f32[4,9], index: 0, kind: input, shape index: {}]   ;;  %s25_s1 = inlined_call_operand.vmem [shape: f32[4,9], index: 1, kind: output, shape index: {}]  }
   0x1   :  { %v2_v0 = vld [vmem:[%s24_s0] sm:$0xf] }
   0x2   :  { %v5_v1 = vxor.u32 2147483648, %v2_v0 }
   0x4   :  { %7 = vst [vmem:[%s25_s1] sm:$0xf] %v5_v1 }

// kernel: phase_encoder_forward.1
= control target key start
LH: loop header
LB: loop body
LE: loop exit
PB: predicated region body
PF: predicated region fallthrough
CT: control target
= control target key end

     0   :  { %s505_s12 = smov 0   ;;  %s507_s13 = smov 0   ;;  %s563_s0 = inlined_call_operand.vmem [shape: f32[8,18], index: 0, kind: input, shape index: {}]   ;;  %s564_s1 = inlined_call_operand.vmem [shape: f32[8,1], index: 1, kind: input, shape index: {}]   ;;  %s565_s2 = inlined_call_operand.vmem [shape: f32[18,512], index: 2, kind: input, shape index: {}]   ;;  %s566_s3 = inlined_call_operand.vmem [shape: f32[4,512], index: 3, kind: output, shape index: {}]  }
   0x1   :  { %s509_s14 = smov 0  }
   0x2 LB: > { %s403_s15 = sadd.s32 4294967295, %s481_s14   ;;  %s522_s16 = sadd.s32 1, %s481_s14   ;;  %s481_s14 = sphi %s509_s14, %s569_s14   ;;  %s477_s13 = sphi %s507_s13, %s568_s13   ;;  %s473_s12 = sphi %s505_s12, %s567_s12  }
   0x3   : > { %s59_s17 = ssub.s32 %s481_s14, %s522_s16  ;;  %s62_s18 = sadd.s32 1, %s477_s13 }
   0x4   : > { %p60_p0 = scmp.eq.s32.totalorder %s59_s17, 0  ;;  %p69_p1 = scmp.ne.s32.totalorder %s477_s13, %s473_s12 }
   0x5   : > { %p70_p2 = scmp.eq.s32.totalorder %s481_s14, 0  ;;  %p406_p4 = scmp.ge.s32.totalorder %s481_s14, 2 }
   0x6   : > { %s531_s19 = scalar_select %p60_p0, %s477_s13, %s62_s18  }
   0x7   : > { %p71_p3 = por %p70_p2, %p69_p1  ;;  %127 = sbr.rel (%p406_p4) target bundleno = 21 (0x15), region = 24 }
   0xe   : > { %130 = sbr.rel (!%p71_p3) target bundleno = 21 (0x15), region = 28  ;;  %s132_s20 = sand.u32 (%p71_p3), 1, %s477_s13  }
   0xf   : > { %s417_s21 = sshll.u32 (%p71_p3), %s481_s14, 4  ;;  %s422_s22 = smul.u32 (%p71_p3), 48, %s132_s20 }
  0x10   : > { %s137_s25 = scalar_lea.vmem (%p71_p3), %s565_s2, %s417_s21 }
  0x11   : > { %v150_v0 = vld [vmem:[%s137_s25] sm:$0xff] (%p71_p3)  ;;  %v152_v1 = vld [vmem:[%s137_s25 + $0x8] sm:$0xff] (%p71_p3)  ;;  %s134_s26 = scalar_lea.vmem (%p71_p3), [#allocation2], %s422_s22 }
  0x12   : > { %v154_v2 = vld [vmem:[%s137_s25 + $0x20] sm:$0xff] (%p71_p3)  ;;  %v156_v3 = vld [vmem:[%s137_s25 + $0x28] sm:$0xff] (%p71_p3)  ;;  %151 = vst [vmem:[%s134_s26] sm:$0xff] (%p71_p3), %v150_v0  ;;  %153 = vst [vmem:[%s134_s26 + $0x8] sm:$0xff] (%p71_p3), %v152_v1 }
  0x13   : > { %v158_v4 = vld [vmem:[%s137_s25 + $0x40] sm:$0xff] (%p71_p3)  ;;  %v160_v5 = vld [vmem:[%s137_s25 + $0x48] sm:$0xff] (%p71_p3)  ;;  %155 = vst [vmem:[%s134_s26 + $0x10] sm:$0xff] (%p71_p3), %v154_v2  ;;  %157 = vst [vmem:[%s134_s26 + $0x18] sm:$0xff] (%p71_p3), %v156_v3 }
  0x14   : > { %159 = vst [vmem:[%s134_s26 + $0x20] sm:$0xff] (%p71_p3), %v158_v4  ;;  %161 = vst [vmem:[%s134_s26 + $0x28] sm:$0xff] (%p71_p3), %v160_v5 }
  0x15 PF: > { %p409_p5 = scmp.ge.s32.totalorder %s481_s14, 1  ;;  %p166_p6 = scmp.lt.s32.totalorder %s481_s14, 3 }
  0x17   : > { %p167_p7 = pnand %p409_p5, %p166_p6 }
  0x18   : > { %s173_s27 = sand.u32 (!%p167_p7), 1, %s473_s12   ;;  %v483_v6 = vmov (!%p167_p7), 0.0   ;;  %v484_v7 = vmov (!%p167_p7), 0   ;;  %v210_v8 = vld [vmem:[%s564_s1] sm:$0xff] (!%p167_p7)  ;;  %vm220_vm0 = vcmask (!%p167_p7), 1041408   ;;  %vm216_vm1 = vcmask (!%p167_p7), 146432  }
  0x19   : > { %170 = sbr.rel (%p167_p7) target bundleno = 292 (0x124), region = 51  ;;  %291 = vmatprep.mubr.f32.mxu0 (!%p167_p7), %v483_v6  ;;  %450 = vset.pattern.permute.xlu0 (!%p167_p7), %v484_v7  ;;  %v203_v17 = vld [vmem:[%s563_s0] sm:$0xff] (!%p167_p7)  ;;  %s410_s7 = sshll.u32 (!%p167_p7), %s403_s15, 1 }
  0x1a   : > { %s423_s28 = smul.u32 (!%p167_p7), 48, %s173_s27  ;;  %213 = vperm.xlu0 (!%p167_p7), %450, %v210_v8   ;;  %p198_p8 = scmp.lt.s32.totalorder (!%p167_p7), %s410_s7, 3 }
  0x1c   : > { %s175_s4 = scalar_lea.vmem (!%p167_p7), [#allocation2], %s423_s28 }
  0x1d   : > { %v205_v9 = vld [vmem:[%s175_s4 + $0x8] sm:$0xff] (!%p167_p7)  ;;  %v207_v10 = vld [vmem:[%s175_s4 + $0x18] sm:$0xff] (!%p167_p7)  ;;  %v204_v11 = vld [vmem:[%s175_s4] sm:$0xff] (!%p167_p7) }
  0x1e   : > { %v418_v12 = vpack.c.bf16 (!%p167_p7), %v207_v10, %v205_v9  ;;  %v206_v13 = vld [vmem:[%s175_s4 + $0x10] sm:$0xff] (!%p167_p7)  ;;  %v209_v15 = vld [vmem:[%s175_s4 + $0x28] sm:$0x3] (!%p167_p7)  ;;  %v208_v16 = vld [vmem:[%s175_s4 + $0x20] sm:$0x3] (!%p167_p7) }
  0x1f   : > { %v420_v14 = vpack.c.bf16 (!%p167_p7), %v206_v13, %v204_v11 }
  0x20   : > { %419 = vmatprep.subr.bf16.mxu0 %v418_v12  ;;  %s571_s7 = smov (!%p198_p8, %s410_s7), 3 }
  0x21   : > { %421 = vmatpush1.bf16.msra.mxu0 %v420_v14  ;;  %s411_s8 = sshll.u32 %s571_s7, 2 }
  0x22   : > { %412 = vmatprep.subr.msk.mxu0 %vm220_vm0, %v209_v15  ;;  %s201_s11 = scalar_lea.vmem %s566_s3, %s411_s8 }
  0x25   : > { %413 = vmatpush1.msk.msra.mxu0 %vm220_vm0, %v208_v16 }
  0x26   : > { %414 = vmatmul.mubr.msk.f32.vlgmr.msra.gmra.mrb[0].mxu0 %vm216_vm1, %v203_v17 }
  0x99   : > { %v214_v18 = vpop.permute.xlu0 %213 }
  0xf9   : > { %v293_v19 = vpop.f32.mrb[0].mxu0 }
  0xfa   : > { %v294_v20 = vadd.f32 %v293_v19, %v214_v18  ;;  %v295_v21 = vpop.f32.mrb[1].mxu0 }
  0xfb   : > { %v296_v22 = vadd.f32 %v295_v21, %v214_v18 }
  0xfc   : > { %v298_v23 = vmul.f32 %v294_v20, %v294_v20 }
  0xfd   : > { %v299_v24 = vmul.f32 %v296_v22, %v296_v22 }
  0xfe   : > { %v302_v25 = vrot.slane %v298_v23, 4 }
  0xff   : > { %v303_v26 = vrot.slane %v299_v24, 4 }
 0x100   : > { %v306_v27 = vadd.f32 %v302_v25, %v298_v23 }
 0x101   : > { %v307_v28 = vadd.f32 %v303_v26, %v299_v24 }
 0x102   : > { %451 = vrsqrt.f32 %v306_v27  ;;  %vm310_vm2 = vcmp.eq.f32.partialorder %v306_v27, inf  ;;  %v313_v32 = vand.u32 2147483648, %v306_v27  ;;  %vm312_vm3 = vcmp.eq.f32.partialorder %v306_v27, 0.0 }
 0x103   : > { %453 = vrsqrt.f32 %v307_v28  ;;  %vm317_vm4 = vcmp.eq.f32.partialorder %v307_v28, inf  ;;  %v320_v37 = vand.u32 2147483648, %v307_v28  ;;  %vm319_vm5 = vcmp.eq.f32.partialorder %v307_v28, 0.0 }
 0x10c   : > { %v452_v29 = vpop.eup %451 }
 0x10d   : > { %v454_v30 = vpop.eup %453  ;;  %v309_v31 = vmul.f32 %v452_v29, %v306_v27 }
 0x10e   : > { %v316_v33 = vmul.f32 %v454_v30, %v307_v28 }
 0x10f   : > { %v311_v34 = vsel %vm310_vm2, %v306_v27, %v309_v31 }
 0x110   : > { %v314_v35 = vsel %vm312_vm3, %v313_v32, %v311_v34  ;;  %v318_v36 = vsel %vm317_vm4, %v307_v28, %v316_v33 }
 0x111   : > { %455 = vrsqrt.f32 %v314_v35  ;;  %v321_v38 = vsel %vm319_vm5, %v320_v37, %v318_v36  ;;  %vm324_vm6 = vcmp.eq.f32.partialorder %v314_v35, inf  ;;  %v327_v42 = vand.u32 2147483648, %v314_v35 }
 0x112   : > { %457 = vrsqrt.f32 %v321_v38  ;;  %vm326_vm7 = vcmp.eq.f32.partialorder %v314_v35, 0.0  ;;  %vm331_vm8 = vcmp.eq.f32.partialorder %v321_v38, inf  ;;  %v334_v46 = vand.u32 2147483648, %v321_v38 }
 0x113   : > { %vm333_vm9 = vcmp.eq.f32.partialorder %v321_v38, 0.0 }
 0x11b   : > { %v456_v39 = vpop.eup %455 }
 0x11c   : > { %v323_v40 = vmul.f32 %v456_v39, %v314_v35  ;;  %v458_v41 = vpop.eup %457 }
 0x11d   : > { %v330_v44 = vmul.f32 %v458_v41, %v321_v38 }
 0x11e   : > { %v325_v43 = vsel %vm324_vm6, %v314_v35, %v323_v40 }
 0x11f   : > { %v328_v45 = vsel %vm326_vm7, %v327_v42, %v325_v43  ;;  %v332_v47 = vsel %vm331_vm8, %v321_v38, %v330_v44 }
 0x120   : > { %v335_v48 = vsel %vm333_vm9, %v334_v46, %v332_v47 }
 0x121   : > { %v338_v49 = vcombine.low %v328_v45, %v335_v48 }
 0x123   : > { %340 = vst [vmem:[%s201_s11] sm:$0xff] %v338_v49 }
 0x124 PF: > { %p10_p9 = scmp.ge.s32.totalorder %s522_s16, 4   ;;  %s567_s12 = smov %s477_s13 }
 0x125   : > { %s568_s13 = smov %s531_s19  ;;  %s569_s14 = smov %s522_s16 }
 0x126   :  { %12 = sbr.rel (!%p10_p9) target bundleno = 2 (0x2), region = 90 }

</bundles_post_ra>
